<compile_context>
chip_gen: v5e
topology: v5e:2x2
jax: 0.10.0
libtpu: 0.0.40
codegen_flags: <defaults>
</compile_context>

<pallas_src>
import functools

import jax
import jax.numpy as jnp
from jax import lax
from jax.experimental import pallas as pl
from jax.experimental.pallas import tpu as pltpu

EV_TO_KCAL_MOL = 23.06052  # same constant used by nff / diffmd `const`


def _round_up(a, b):
    return (a + b - 1) // b * b


def _stack_kernel(xt_ref, w1f_ref, w1t_ref, b1_ref, w2_ref, e_ref, gt_ref,
                  *, n_atoms, tn, mask_pad):
    xt = xt_ref[...]      # (3, TN)       coordinates^T, atoms on lanes
    w1f = w1f_ref[...]    # (3, KH_pad)   fused first-layer weights (MXU operand)
    w1t = w1t_ref[...]    # (KH_pad, 3)   same, transposed (VPU FMA operand)
    b1 = b1_ref[...]      # (KH_pad, 1)   fused first-layer bias
    w2 = w2_ref[...]      # (KH_pad, 1)   fused second-layer weights, pre-scaled by 1/EV

    # pre^T[m, n] = sum_c w1[c, m] * x[n, c] + b1[m]
    # Depth-3 contraction as three VPU broadcast-FMAs (MXU would be >97% idle at K=3).
    pre = (w1t[:, 0:1] * xt[0:1, :]
           + w1t[:, 1:2] * xt[1:2, :]
           + w1t[:, 2:3] * xt[2:3, :]
           + b1)                                        # (KH_pad, TN)
    h = jnp.tanh(pre)                                   # EUP — the saturating unit
    w2b = jnp.broadcast_to(w2, pre.shape)               # broadcast once, reuse twice
    t = h * w2b                                         # (KH_pad, TN)

    # Per-tile partial energy: reduce hidden (sublanes) first, mask padded atoms on
    # the cheap (1, TN) row, then reduce lanes.
    col = jnp.sum(t, axis=0, keepdims=True)             # (1, TN)
    if mask_pad:
        lane = lax.broadcasted_iota(jnp.int32, (1, tn), 1)
        valid = (pl.program_id(0) * tn + lane) < n_atoms
        col = jnp.where(valid, col, 0.0)
    part = jnp.sum(col)
    # Full-vreg (1, 8, 128) splat store: unmasked vst, disjoint per tile (parallel-safe).
    e_ref[...] = jnp.zeros(e_ref.shape, jnp.float32) + part

    # Analytic gradient, lane-dense as grad^T (3, TN):
    #   dh = (1 - h^2) * w2 = w2 - h*(h*w2) = w2 - h*t     (already /EV scaled)
    dh = w2b - h * t                                     # (KH_pad, TN)
    gt_ref[...] = lax.dot_general(
        w1f, dh,
        dimension_numbers=(((1,), (0,)), ((), ())),      # contract fused KH axis (MXU native)
        preferred_element_type=jnp.float32)              # (3, TN)


def stack_forward(x, w1, b1, w2, b2, *, tile_atoms=None):
    """x: (N, 3) f32; w1: (K, 3, H); b1: (K, H); w2: (K, H); b2: (K, 1)."""
    K, _, H = w1.shape
    N = x.shape[0]
    KH = K * H
    kh_pad = _round_up(KH, 128)
    inv = jnp.float32(1.0 / EV_TO_KCAL_MOL)

    # --- atom-axis tile size (lanes): multiple of 128, sized so ~6 live (KH, TN) f32
    # intermediates stay <= ~8 MiB — safe within v7x's 64 MiB VMEM / 32 MiB scoped budget.
    if tile_atoms is None:
        cap = max(128, (8 * 1024 * 1024) // (6 * kh_pad * 4) // 128 * 128)
        tile_atoms = min(1024, cap)
    tn = _round_up(min(tile_atoms, _round_up(N, 128)), 128)
    n_pad = _round_up(N, tn)
    num_tiles = n_pad // tn

    # --- wrapper-side weight prep (one-time glue): fuse K models along the hidden axis,
    # zero-pad KH to a multiple of 128, fold 1/EV into w2/b2.
    w1_f = jnp.transpose(w1, (1, 0, 2)).reshape(3, KH).astype(jnp.float32)
    w1_f = jnp.pad(w1_f, ((0, 0), (0, kh_pad - KH)))                       # (3, KH_pad)
    w1_t = w1_f.T                                                          # (KH_pad, 3)
    b1_c = jnp.pad(b1.reshape(KH, 1).astype(jnp.float32), ((0, kh_pad - KH), (0, 0)))
    w2_c = jnp.pad(w2.reshape(KH, 1).astype(jnp.float32), ((0, kh_pad - KH), (0, 0))) * inv
    # NOTE: per the reference semantics, b2[k] is counted once per *atom* (it broadcasts
    # over the (N, 1) per-atom energies before the sum).
    b2_s = jnp.float32(N) * jnp.sum(b2.astype(jnp.float32)) * inv

    # Coordinates transposed + zero-padded: lane-dense (3, N_pad), atoms on lanes.
    x_t = jnp.pad(x.astype(jnp.float32), ((0, n_pad - N), (0, 0))).T

    # Explicit VMEM budget: live intermediates + double-buffered I/O + weights, 2x headroom.
    intermed = 6 * kh_pad * tn * 4
    io = 2 * (3 * tn * 4) * 2 + 2 * (8 * 128 * 4)
    wts = 2 * (3 * kh_pad + kh_pad * 3 + 2 * kh_pad) * 4
    vmem_limit = int(min(32 * 1024 * 1024, max(2 * (intermed + io + wts), 16 * 1024 * 1024)))

    kernel = functools.partial(_stack_kernel, n_atoms=N, tn=tn, mask_pad=(n_pad != N))

    e_parts, grad_t = pl.pallas_call(
        kernel,
        out_shape=(
            jax.ShapeDtypeStruct((num_tiles, 8, 128), jnp.float32),  # per-tile partial energies
            jax.ShapeDtypeStruct((3, n_pad), jnp.float32),           # grad^T, lane-dense
        ),
        grid_spec=pltpu.PrefetchScalarGridSpec(
            num_scalar_prefetch=0,
            grid=(num_tiles,),
            in_specs=[
                pl.BlockSpec((3, tn), lambda i: (0, i)),          # x^T tile (atoms on lanes)
                pl.BlockSpec((3, kh_pad), lambda i: (0, 0)),      # W1 fused (grad MXU operand)
                pl.BlockSpec((kh_pad, 3), lambda i: (0, 0)),      # W1 fused^T (FMA operand)
                pl.BlockSpec((kh_pad, 1), lambda i: (0, 0)),      # b1 fused
                pl.BlockSpec((kh_pad, 1), lambda i: (0, 0)),      # w2 fused (pre-scaled)
            ],
            out_specs=[
                pl.BlockSpec((1, 8, 128), lambda i: (i, 0, 0)),
                pl.BlockSpec((3, tn), lambda i: (0, i)),
            ],
        ),
        compiler_params=pltpu.CompilerParams(
            dimension_semantics=("parallel",),      # independent atom tiles -> dual-TC on v7x
            vmem_limit_bytes=vmem_limit),
    )(x_t, w1_f, w1_t, b1_c, w2_c)

    energy = jnp.sum(e_parts[:, 0, 0]) + b2_s
    # TODO(synk): if the downstream consumer accepts grad as (3, N), return grad_t[:, :N]
    # directly and drop this transpose (pure layout plumbing, extra 12N-byte HBM round-trip).
    grad = grad_t[:, :N].T
    return {"energy": energy, "energy_grad": grad}


def _stack_reference(x, w1, b1, w2, b2):
    """Pure-JAX reference of the same Stack semantics (per-model loop)."""
    K = w1.shape[0]
    e = jnp.float32(0.0)
    g = jnp.zeros_like(x)
    for k in range(K):
        h = jnp.tanh(x @ w1[k] + b1[k][None, :])
        e = e + jnp.sum(jnp.sum(h * w2[k][None, :], axis=-1, keepdims=True) + b2[k])
        g = g + ((1.0 - h * h) * w2[k][None, :]) @ w1[k].T
    return {"energy": e / EV_TO_KCAL_MOL, "energy_grad": g / EV_TO_KCAL_MOL}


def _check(out, ref, label):
    assert jnp.allclose(out["energy"], ref["energy"], atol=1e-4, rtol=1e-4), \
        f"{label}: energy mismatch"
    assert jnp.allclose(out["energy_grad"], ref["energy_grad"], atol=1e-4, rtol=1e-4), \
        f"{label}: energy_grad mismatch"


if __name__ == "__main__":
    key = jax.random.PRNGKey(0)
    kx, k1, k2, k3, k4, kx2 = jax.random.split(key, 6)

    N, H, K = 32, 32, 3  # atoms, hidden width, number of stacked potentials
    x = jax.random.normal(kx, (N, 3), dtype=jnp.float32)
    w1 = 0.1 * jax.random.normal(k1, (K, 3, H), dtype=jnp.float32)
    b1 = 0.1 * jax.random.normal(k2, (K, H), dtype=jnp.float32)
    w2 = 0.1 * jax.random.normal(k3, (K, H), dtype=jnp.float32)
    b2 = 0.1 * jax.random.normal(k4, (K, 1), dtype=jnp.float32)

    out = stack_forward(x, w1, b1, w2, b2)
    jax.block_until_ready(out["energy"])
    jax.block_until_ready(out["energy_grad"])
    _check(out, _stack_reference(x, w1, b1, w2, b2), "single-tile")

    # Multi-tile + lane-padding path: N not a multiple of the 128-atom tile.
    N2 = 300
    x2 = jax.random.normal(kx2, (N2, 3), dtype=jnp.float32)
    out2 = stack_forward(x2, w1, b1, w2, b2, tile_atoms=128)
    jax.block_until_ready(out2["energy"])
    jax.block_until_ready(out2["energy_grad"])
    _check(out2, _stack_reference(x2, w1, b1, w2, b2), "multi-tile")

    print("KERNEL_OK")
</pallas_src>

<mosaic_0001>
module attributes {stable_mosaic.version = 11 : i64} {
  func.func @_stack_kernel(%arg0: i32, %arg1: memref<3x128xf32, #tpu.memory_space<vmem>>, %arg2: memref<3x128xf32, #tpu.memory_space<vmem>>, %arg3: memref<128x3xf32, #tpu.memory_space<vmem>>, %arg4: memref<128x1xf32, #tpu.memory_space<vmem>>, %arg5: memref<128x1xf32, #tpu.memory_space<vmem>>, %arg6: memref<1x8x128xf32, #tpu.memory_space<vmem>>, %arg7: memref<3x128xf32, #tpu.memory_space<vmem>>) attributes {dimension_semantics = [#tpu.dimension_semantics<parallel>], iteration_bounds = array<i64: 1>, scalar_prefetch = 0 : i64, scratch_operands = 0 : i64, tpu.core_type = #tpu.core_type<tc>, window_params = [{transform_indices = @transform_0, window_bounds = array<i64: 3, 128>}, {pipeline_mode = #tpu.pipeline_mode<synchronous>, transform_indices = @transform_1, window_bounds = array<i64: 3, 128>}, {pipeline_mode = #tpu.pipeline_mode<synchronous>, transform_indices = @transform_2, window_bounds = array<i64: 128, 3>}, {pipeline_mode = #tpu.pipeline_mode<synchronous>, transform_indices = @transform_3, window_bounds = array<i64: 128, 1>}, {pipeline_mode = #tpu.pipeline_mode<synchronous>, transform_indices = @transform_4, window_bounds = array<i64: 128, 1>}, {transform_indices = @transform_5, window_bounds = array<i64: 1, 8, 128>}, {transform_indices = @transform_6, window_bounds = array<i64: 3, 128>}]} {
    %c0 = arith.constant 0 : index
    %c0_0 = arith.constant 0 : index
    %0 = vector.load %arg1[%c0, %c0_0] : memref<3x128xf32, #tpu.memory_space<vmem>>, vector<3x128xf32>
    %c0_1 = arith.constant 0 : index
    %c0_2 = arith.constant 0 : index
    %1 = vector.load %arg2[%c0_1, %c0_2] : memref<3x128xf32, #tpu.memory_space<vmem>>, vector<3x128xf32>
    %c0_3 = arith.constant 0 : index
    %c0_4 = arith.constant 0 : index
    %2 = vector.load %arg3[%c0_3, %c0_4] : memref<128x3xf32, #tpu.memory_space<vmem>>, vector<128x3xf32>
    %c0_5 = arith.constant 0 : index
    %c0_6 = arith.constant 0 : index
    %3 = vector.load %arg4[%c0_5, %c0_6] : memref<128x1xf32, #tpu.memory_space<vmem>>, vector<128x1xf32>
    %c0_7 = arith.constant 0 : index
    %c0_8 = arith.constant 0 : index
    %4 = vector.load %arg5[%c0_7, %c0_8] : memref<128x1xf32, #tpu.memory_space<vmem>>, vector<128x1xf32>
    %5 = vector.extract_strided_slice %2 {offsets = [0, 0], sizes = [128, 1], strides = [1, 1]} : vector<128x3xf32> to vector<128x1xf32>
    %6 = vector.extract_strided_slice %0 {offsets = [0, 0], sizes = [1, 128], strides = [1, 1]} : vector<3x128xf32> to vector<1x128xf32>
    %7 = vector.broadcast %5 : vector<128x1xf32> to vector<128x128xf32>
    %8 = vector.broadcast %6 : vector<1x128xf32> to vector<128x128xf32>
    %9 = arith.mulf %7, %8 : vector<128x128xf32>
    %10 = vector.extract_strided_slice %2 {offsets = [0, 1], sizes = [128, 1], strides = [1, 1]} : vector<128x3xf32> to vector<128x1xf32>
    %11 = vector.extract_strided_slice %0 {offsets = [1, 0], sizes = [1, 128], strides = [1, 1]} : vector<3x128xf32> to vector<1x128xf32>
    %12 = vector.broadcast %10 : vector<128x1xf32> to vector<128x128xf32>
    %13 = vector.broadcast %11 : vector<1x128xf32> to vector<128x128xf32>
    %14 = arith.mulf %12, %13 : vector<128x128xf32>
    %15 = arith.addf %9, %14 : vector<128x128xf32>
    %16 = vector.extract_strided_slice %2 {offsets = [0, 2], sizes = [128, 1], strides = [1, 1]} : vector<128x3xf32> to vector<128x1xf32>
    %17 = vector.extract_strided_slice %0 {offsets = [2, 0], sizes = [1, 128], strides = [1, 1]} : vector<3x128xf32> to vector<1x128xf32>
    %18 = vector.broadcast %16 : vector<128x1xf32> to vector<128x128xf32>
    %19 = vector.broadcast %17 : vector<1x128xf32> to vector<128x128xf32>
    %20 = arith.mulf %18, %19 : vector<128x128xf32>
    %21 = arith.addf %15, %20 : vector<128x128xf32>
    %22 = vector.broadcast %3 : vector<128x1xf32> to vector<128x128xf32>
    %23 = arith.addf %21, %22 : vector<128x128xf32>
    %24 = math.tanh %23 : vector<128x128xf32>
    %25 = vector.shape_cast %4 : vector<128x1xf32> to vector<128x1xf32>
    %26 = vector.broadcast %25 : vector<128x1xf32> to vector<128x128xf32>
    %27 = arith.mulf %24, %26 : vector<128x128xf32>
    %cst = arith.constant dense<0.000000e+00> : vector<128xf32>
    %28 = vector.multi_reduction <add>, %27, %cst [0] : vector<128x128xf32> to vector<128xf32>
    %29 = vector.shape_cast %28 : vector<128xf32> to vector<1x128xf32>
    %30 = tpu.iota {dimensions = array<i32: 1>} : vector<1x128xi32>
    %c128_i32 = arith.constant 128 : i32
    %31 = arith.muli %arg0, %c128_i32 : i32
    %32 = vector.broadcast %31 : i32 to vector<1x128xi32>
    %33 = arith.addi %32, %30 : vector<1x128xi32>
    %c32_i32 = arith.constant 32 : i32
    %34 = vector.broadcast %c32_i32 : i32 to vector<1x128xi32>
    %35 = arith.cmpi slt, %33, %34 : vector<1x128xi32>
    %cst_9 = arith.constant 0.000000e+00 : f32
    %36 = vector.broadcast %cst_9 : f32 to vector<1x128xf32>
    %37 = arith.select %35, %29, %36 : vector<1x128xi1>, vector<1x128xf32>
    %38 = vector.shape_cast %37 : vector<1x128xf32> to vector<1x1x128xf32>
    %cst_10 = arith.constant dense<0.000000e+00> : vector<1xf32>
    %39 = vector.multi_reduction <add>, %38, %cst_10 [1, 2] : vector<1x1x128xf32> to vector<1xf32>
    %40 = vector.shape_cast %39 : vector<1xf32> to vector<1x1x1xf32>
    %41 = vector.extract %40[0, 0, 0] : f32 from vector<1x1x1xf32>
    %cst_11 = arith.constant 0.000000e+00 : f32
    %42 = vector.broadcast %cst_11 : f32 to vector<1x8x128xf32>
    %43 = vector.broadcast %41 : f32 to vector<1x8x128xf32>
    %44 = arith.addf %42, %43 : vector<1x8x128xf32>
    %c0_12 = arith.constant 0 : index
    %c0_13 = arith.constant 0 : index
    %c0_14 = arith.constant 0 : index
    %45 = vector.load %arg6[%c0_12, %c0_13, %c0_14] : memref<1x8x128xf32, #tpu.memory_space<vmem>>, vector<1x8x128xf32>
    tpu.vector_store %arg6[%c0_12, %c0_13, %c0_14], %44 {strides = array<i32>} : memref<1x8x128xf32, #tpu.memory_space<vmem>>, vector<1x8x128xf32>,
    %46 = arith.mulf %24, %27 : vector<128x128xf32>
    %47 = arith.subf %26, %46 : vector<128x128xf32>
    %cst_15 = arith.constant dense<0.000000e+00> : vector<3x128xf32>
    %48 = tpu.matmul %1, %47, %cst_15 {dimension_numbers = #tpu.dot_dimension_numbers<[1], [0], [0], [1], [0, 0, 1, 1], [], []>} : vector<3x128xf32>, vector<128x128xf32>, vector<3x128xf32> -> vector<3x128xf32>
    %c0_16 = arith.constant 0 : index
    %c0_17 = arith.constant 0 : index
    %49 = vector.load %arg7[%c0_16, %c0_17] : memref<3x128xf32, #tpu.memory_space<vmem>>, vector<3x128xf32>
    tpu.vector_store %arg7[%c0_16, %c0_17], %48 {strides = array<i32>} : memref<3x128xf32, #tpu.memory_space<vmem>>, vector<3x128xf32>,
    return
  }
  func.func @transform_0(%arg0: i32) -> (i32, i32) {
    %c0_i32 = arith.constant 0 : i32
    %c0_i32_0 = arith.constant 0 : i32
    return %c0_i32, %arg0 : i32, i32
  }
  func.func @transform_1(%arg0: i32) -> (i32, i32) {
    %c0_i32 = arith.constant 0 : i32
    %c0_i32_0 = arith.constant 0 : i32
    %c0_i32_1 = arith.constant 0 : i32
    return %c0_i32, %c0_i32_0 : i32, i32
  }
  func.func @transform_2(%arg0: i32) -> (i32, i32) {
    %c0_i32 = arith.constant 0 : i32
    %c0_i32_0 = arith.constant 0 : i32
    %c0_i32_1 = arith.constant 0 : i32
    return %c0_i32, %c0_i32_0 : i32, i32
  }
  func.func @transform_3(%arg0: i32) -> (i32, i32) {
    %c0_i32 = arith.constant 0 : i32
    %c0_i32_0 = arith.constant 0 : i32
    %c0_i32_1 = arith.constant 0 : i32
    return %c0_i32, %c0_i32_0 : i32, i32
  }
  func.func @transform_4(%arg0: i32) -> (i32, i32) {
    %c0_i32 = arith.constant 0 : i32
    %c0_i32_0 = arith.constant 0 : i32
    %c0_i32_1 = arith.constant 0 : i32
    return %c0_i32, %c0_i32_0 : i32, i32
  }
  func.func @transform_5(%arg0: i32) -> (i32, i32, i32) {
    %c0_i32 = arith.constant 0 : i32
    %c0_i32_0 = arith.constant 0 : i32
    %c0_i32_1 = arith.constant 0 : i32
    return %arg0, %c0_i32, %c0_i32_0 : i32, i32, i32
  }
  func.func @transform_6(%arg0: i32) -> (i32, i32) {
    %c0_i32 = arith.constant 0 : i32
    %c0_i32_0 = arith.constant 0 : i32
    return %c0_i32, %arg0 : i32, i32
  }
}

</mosaic_0001>

<bundles_post_ra>
// kernel: tpu_custom_call.1
= control target key start
LH: loop header
LB: loop body
LE: loop exit
PB: predicated region body
PF: predicated region fallthrough
CT: control target
= control target key end

     0   :  { %12 = vsyncpa [#allocation3], 0  ;;  %v802_v2 = vmov 1   ;;  %v803_v3 = vmov 0   ;;  %s1237_s0 = inlined_call_operand.vmem [shape: f32[3,128], index: 0, kind: input, shape index: {}]   ;;  %s1238_s1 = inlined_call_operand.vmem [shape: f32[3,128], index: 1, kind: input, shape index: {}]   ;;  %s1239_s2 = inlined_call_operand.vmem [shape: f32[128,3], index: 2, kind: input, shape index: {}]   ;;  %s1240_s3 = inlined_call_operand.vmem [shape: f32[128,1], index: 3, kind: input, shape index: {}]   ;;  %s1241_s4 = inlined_call_operand.vmem [shape: f32[128,1], index: 4, kind: input, shape index: {}]   ;;  %s1242_s5 = inlined_call_operand.hbm [shape: f32[1,8,128], index: 5, kind: output, shape index: {0}]   ;;  %s1243_s6 = inlined_call_operand.hbm [shape: f32[3,128], index: 6, kind: output, shape index: {1}]  }
   0x1   :  { %v845_v0 = vld [vmem:[%s1239_s2 + $0x20] sm:$0xff]  ;;  %v28_v1 = vld [vmem:[%s1239_s2 + $0x10] sm:$0xff]  ;;  %711 = vset.pattern.permute.xlu0 %v802_v2  ;;  %708 = vset.pattern.permute.xlu2 %v803_v3 }
   0x2   :  { %707 = vset.pattern.permute.xlu1 %v803_v3  ;;  %96 = vperm.xlu2 %708, %v845_v0  }
   0x3   :  { %180 = vperm.xlu0 %711, %v28_v1   ;;  %86 = vperm.xlu1 %707, %v28_v1  }
   0x4   :  { %13 = vsyncpa [#allocation5], 0  ;;  %v31_v4 = vld [vmem:[%s1239_s2 + $0x28] sm:$0xff]  ;;  %v33_v5 = vld [vmem:[%s1239_s2 + $0x38] sm:$0xff]  ;;  %v804_v13 = vmov 2   ;;  %vm601_vm1 = vcmask 1040384  }
   0x5   :  { %v29_v6 = vld [vmem:[%s1239_s2 + $0x18] sm:$0xff]  ;;  %v34_v7 = vld [vmem:[%s1239_s2 + $0x40] sm:$0xff]  ;;  %v36_v8 = vld [vmem:[%s1239_s2 + $0x50] sm:$0xff]  ;;  %s686_s20 = sshll.u32 %s1243_s6, 4  ;;  %s806_s21 = smov [#allocation2]   ;;  %s687_s20 = int_to_ptr.hbm [resolvable:$true] %s686_s20 }
   0x6   :  { %v37_v9 = vld [vmem:[%s1239_s2 + $0x58] sm:$0xff]  ;;  %v874_v10 = vld [vmem:[%s1239_s2 + $0x68] sm:$0xff]  ;;  %v40_v11 = vld [vmem:[%s1239_s2 + $0x70] sm:$0xff]  ;;  %s673_s22 = sshll.u32 %s806_s21, 4  ;;  %s675_s25 = sshll.u32 %s1242_s5, 4  ;;  %s674_s22 = int_to_ptr.vmem [resolvable:$true] %s673_s22  ;;  %s676_s25 = int_to_ptr.hbm [resolvable:$true] %s675_s25 }
   0x7   :  { %v26_v12 = vld [vmem:[%s1239_s2] sm:$0xff]  ;;  %v27_v14 = vld [vmem:[%s1239_s2 + $0x8] sm:$0xff]  ;;  %v32_v15 = vld [vmem:[%s1239_s2 + $0x30] sm:$0xff] }
   0x8   :  { %v35_v16 = vld [vmem:[%s1239_s2 + $0x48] sm:$0xff]  ;;  %v38_v17 = vld [vmem:[%s1239_s2 + $0x60] sm:$0xff]  ;;  %v41_v18 = vld [vmem:[%s1239_s2 + $0x78] sm:$0xff] }
   0x9   :  { %v909_v22 = vld [vmem:[%s1237_s0] sm:$0x7]  ;;  %v56_v31 = vld [vmem:[%s1240_s3 + $0x70] sm:$0xff]  ;;  %v57_v36 = vld [vmem:[%s1240_s3 + $0x78] sm:$0xff] }
   0xa   :  { %101 = vperm.xlu2 %708, %v31_v4   ;;  %v912_v23 = vperm.slane %v909_v22, 0  ;;  %v915_v24 = vperm.slane %v909_v22, 1  ;;  %v52_v35 = vld [vmem:[%s1240_s3 + $0x50] sm:$0xff]  ;;  %v71_v43 = vld [vmem:[%s1241_s4 + $0x68] sm:$0xff]  ;;  %v54_v44 = vld [vmem:[%s1240_s3 + $0x60] sm:$0xff] }
   0xb   :  { %200 = vperm.xlu0 %711, %v33_v5   ;;  %91 = vperm.xlu1 %707, %v29_v6   ;;  %v55_v45 = vld [vmem:[%s1240_s3 + $0x68] sm:$0xff]  ;;  %v50_v55 = vld [vmem:[%s1240_s3 + $0x40] sm:$0xff]  ;;  %v73_v56 = vld [vmem:[%s1241_s4 + $0x78] sm:$0xff] }
   0xc   :  { %v53_v57 = vld [vmem:[%s1240_s3 + $0x58] sm:$0xff] }
  0x12   :  { %116 = vperm.xlu2 %708, %v34_v7  }
  0x13   :  { %212 = vperm.xlu0 %711, %v36_v8   ;;  %111 = vperm.xlu1 %707, %v33_v5  }
  0x1a   :  { %131 = vperm.xlu2 %708, %v37_v9  }
  0x1b   :  { %224 = vperm.xlu0 %711, %v874_v10   ;;  %126 = vperm.xlu1 %707, %v36_v8  }
  0x22   :  { %146 = vperm.xlu2 %708, %v40_v11  }
  0x23   :  { %712 = vset.pattern.permute.xlu0 %v804_v13  ;;  %141 = vperm.xlu1 %707, %v874_v10  }
  0x24   :  { %269 = vperm.xlu0 %712, %v26_v12  }
  0x2a   :  { %710 = vset.pattern.permute.xlu2 %v802_v2 }
  0x2b   :  { %709 = vset.pattern.permute.xlu1 %v802_v2  ;;  %176 = vperm.xlu2 %710, %v27_v14   ;;  %v72_v2 = vld [vmem:[%s1241_s4 + $0x70] sm:$0xff] }
  0x2c   :  { %289 = vperm.xlu0 %712, %v31_v4   ;;  %172 = vperm.xlu1 %709, %v26_v12  }
  0x33   :  { %188 = vperm.xlu2 %710, %v845_v0  }
  0x34   :  { %301 = vperm.xlu0 %712, %v34_v7   ;;  %184 = vperm.xlu1 %709, %v29_v6  }
  0x3b   :  { %196 = vperm.xlu2 %710, %v32_v15  }
  0x3c   :  { %313 = vperm.xlu0 %712, %v37_v9   ;;  %192 = vperm.xlu1 %709, %v31_v4  }
  0x43   :  { %208 = vperm.xlu2 %710, %v35_v16  }
  0x44   :  { %325 = vperm.xlu0 %712, %v40_v11   ;;  %204 = vperm.xlu1 %709, %v34_v7   ;;  %v43_v7 = vld [vmem:[%s1240_s3 + $0x8] sm:$0xff] }
  0x4b   :  { %220 = vperm.xlu2 %710, %v38_v17  }
  0x4c   :  { %715 = vset.pattern.permute.xlu0 %v803_v3  ;;  %216 = vperm.xlu1 %709, %v37_v9  }
  0x4d   :  { %76 = vperm.xlu0 %715, %v26_v12  }
  0x53   :  { %232 = vperm.xlu2 %710, %v41_v18  }
  0x54   :  { %228 = vperm.xlu1 %709, %v40_v11  }
  0x55   :  { %81 = vperm.xlu0 %715, %v27_v14  }
  0x5b   :  { %714 = vset.pattern.permute.xlu2 %v804_v13 }
  0x5c   :  { %713 = vset.pattern.permute.xlu1 %v804_v13  ;;  %277 = vperm.xlu2 %714, %v28_v1   ;;  %v97_v19 = vpop.permute.xlu2 %96  ;;  %v51_v1 = vld [vmem:[%s1240_s3 + $0x48] sm:$0xff] }
  0x5d   :  { %106 = vperm.xlu0 %715, %v32_v15   ;;  %273 = vperm.xlu1 %713, %v27_v14   ;;  %v159_v51 = vmul.f32 %v912_v23, %v97_v19 }
  0x64   :  { %285 = vperm.xlu2 %714, %v845_v0   ;;  %v902_v20 = vpop.permute.xlu2 %101  ;;  %v49_v0 = vld [vmem:[%s1240_s3 + $0x38] sm:$0xff] }
  0x65   :  { %121 = vperm.xlu0 %715, %v35_v16   ;;  %281 = vperm.xlu1 %713, %v29_v6   ;;  %v48_v6 = vld [vmem:[%s1240_s3 + $0x30] sm:$0xff] }
  0x6c   :  { %297 = vperm.xlu2 %714, %v33_v5   ;;  %v904_v21 = vpop.permute.xlu2 %116 }
  0x6d   :  { %136 = vperm.xlu0 %715, %v38_v17   ;;  %293 = vperm.xlu1 %713, %v32_v15   ;;  %v47_v15 = vld [vmem:[%s1240_s3 + $0x28] sm:$0xff] }
  0x74   :  { %309 = vperm.xlu2 %714, %v36_v8   ;;  %v917_v25 = vpop.permute.xlu2 %131  ;;  %v42_v8 = vld [vmem:[%s1240_s3] sm:$0xff] }
  0x75   :  { %v181_v26 = vpop.permute.xlu0 %180  ;;  %v87_v27 = vpop.permute.xlu1 %86  ;;  %151 = vperm.xlu0 %715, %v41_v18   ;;  %305 = vperm.xlu1 %713, %v35_v16   ;;  %v44_v16 = vld [vmem:[%s1240_s3 + $0x10] sm:$0xff] }
  0x76   :  { %v238_v28 = vmul.f32 %v915_v24, %v181_v26  ;;  %v157_v29 = vmul.f32 %v912_v23, %v87_v27 }
  0x78   :  { %v921_v30 = vadd.f32 %v238_v28, %v157_v29  ;;  %v160_v28 = vmul.f32 %v912_v23, %v902_v20 }
  0x7c   :  { %321 = vperm.xlu2 %714, %v874_v10   ;;  %v927_v32 = vpop.permute.xlu2 %146 }
  0x7d   :  { %v201_v33 = vpop.permute.xlu0 %200  ;;  %v92_v34 = vpop.permute.xlu1 %91  ;;  %437 = vperm.xlu0 %715, %v56_v31   ;;  %317 = vperm.xlu1 %713, %v38_v17   ;;  %v70_v17 = vld [vmem:[%s1241_s4 + $0x60] sm:$0xff] }
  0x7e   :  { %v243_v37 = vmul.f32 %v915_v24, %v201_v33  ;;  %v158_v12 = vmul.f32 %v912_v23, %v92_v34  ;;  %v59_v34 = vld [vmem:[%s1241_s4 + $0x8] sm:$0xff] }
  0x84   :  { %716 = vset.pattern.permute.xlu2 %v803_v3 }
  0x85   :  { %v213_v38 = vpop.permute.xlu0 %212  ;;  %v112_v39 = vpop.permute.xlu1 %111  ;;  %417 = vperm.xlu0 %715, %v52_v35   ;;  %329 = vperm.xlu1 %713, %v41_v18   ;;  %v1013_v18 = vperm.slane %v909_v22, 2  ;;  %v45_v22 = vld [vmem:[%s1240_s3 + $0x18] sm:$0xff] }
  0x86   :  { %v162_v40 = vmul.f32 %v912_v23, %v112_v39  ;;  %442 = vperm.xlu2 %716, %v57_v36   ;;  %v938_v41 = vpop.permute.xlu2 %176  ;;  %v246_v46 = vmul.f32 %v915_v24, %v213_v38  ;;  %v69_v35 = vld [vmem:[%s1241_s4 + $0x58] sm:$0xff] }
  0x88   :  { %v940_v42 = vadd.f32 %v243_v37, %v162_v40  ;;  %v163_v40 = vmul.f32 %v912_v23, %v904_v21  ;;  %v68_v21 = vld [vmem:[%s1241_s4 + $0x50] sm:$0xff] }
  0x8d   :  { %v225_v47 = vpop.permute.xlu0 %224  ;;  %v127_v48 = vpop.permute.xlu1 %126  ;;  %544 = vperm.xlu0 %715, %v71_v43   ;;  %717 = vset.pattern.permute.xlu1 %v803_v3 }
  0x8e   :  { %v165_v49 = vmul.f32 %v912_v23, %v127_v48  ;;  %427 = vperm.xlu2 %716, %v54_v44   ;;  %v189_v50 = vpop.permute.xlu2 %188  ;;  %432 = vperm.xlu1 %717, %v55_v45   ;;  %v249_v59 = vmul.f32 %v915_v24, %v225_v47  ;;  %v65_v47 = vld [vmem:[%s1241_s4 + $0x38] sm:$0xff]  ;;  %v46_v48 = vld [vmem:[%s1240_s3 + $0x20] sm:$0xff] }
  0x8f   :  { %v240_v52 = vmul.f32 %v915_v24, %v189_v50 }
  0x90   :  { %v956_v53 = vadd.f32 %v246_v46, %v165_v49 }
  0x91   :  { %v958_v54 = vadd.f32 %v240_v52, %v159_v51 }
  0x95   :  { %v142_v58 = vpop.permute.xlu1 %141  ;;  %407 = vperm.xlu0 %715, %v50_v55   ;;  %v166_v55 = vmul.f32 %v912_v23, %v917_v25  ;;  %v62_v25 = vld [vmem:[%s1241_s4 + $0x20] sm:$0xff] }
  0x96   :  { %v168_v60 = vmul.f32 %v912_v23, %v142_v58  ;;  %554 = vperm.xlu2 %716, %v73_v56   ;;  %v971_v61 = vpop.permute.xlu2 %196  ;;  %v973_v62 = vpop.permute.xlu0 %269  ;;  %422 = vperm.xlu1 %717, %v53_v57  }
  0x98   :  { %v975_v63 = vadd.f32 %v249_v59, %v168_v60  ;;  %v333_v60 = vmul.f32 %v1013_v18, %v973_v62 }
  0x9d   :  { %402 = vperm.xlu0 %715, %v49_v0  }
  0x9e   :  { %412 = vperm.xlu2 %716, %v51_v1   ;;  %v986_v3 = vpop.permute.xlu2 %208  ;;  %v290_v4 = vpop.permute.xlu0 %289  ;;  %549 = vperm.xlu1 %717, %v72_v2  }
  0x9f   :  { %v173_v5 = vpop.permute.xlu1 %172  ;;  %v338_v31 = vmul.f32 %v1013_v18, %v290_v4  ;;  %v58_v4 = vld [vmem:[%s1241_s4] sm:$0xff] }
  0xa0   :  { %v236_v56 = vmul.f32 %v915_v24, %v173_v5 }
  0xa5   :  { %397 = vperm.xlu0 %715, %v48_v6  }
  0xa6   :  { %372 = vperm.xlu2 %716, %v43_v7   ;;  %v997_v9 = vpop.permute.xlu2 %220  ;;  %v302_v10 = vpop.permute.xlu0 %301  ;;  %367 = vperm.xlu1 %717, %v42_v8  }
  0xa7   :  { %v185_v11 = vpop.permute.xlu1 %184  ;;  %v341_v45 = vmul.f32 %v1013_v18, %v302_v10 }
  0xa8   :  { %v239_v13 = vmul.f32 %v915_v24, %v185_v11  ;;  %v237_v11 = vmul.f32 %v915_v24, %v938_v41 }
  0xaa   :  { %v1001_v14 = vadd.f32 %v239_v13, %v158_v12 }
  0xad   :  { %392 = vperm.xlu0 %715, %v47_v15  }
  0xae   :  { %377 = vperm.xlu2 %716, %v44_v16   ;;  %v1015_v19 = vpop.permute.xlu2 %232  ;;  %v314_v26 = vpop.permute.xlu0 %313  ;;  %539 = vperm.xlu1 %717, %v70_v17   ;;  %v60_v16 = vld [vmem:[%s1241_s4 + $0x10] sm:$0xff]  ;;  %v66_v17 = vld [vmem:[%s1241_s4 + $0x40] sm:$0xff] }
  0xaf   :  { %v193_v27 = vpop.permute.xlu1 %192  ;;  %v344_v0 = vmul.f32 %v1013_v18, %v314_v26 }
  0xb0   :  { %v241_v29 = vmul.f32 %v915_v24, %v193_v27 }
  0xb2   :  { %v257_v33 = vadd.f32 %v241_v29, %v160_v28  ;;  %v242_v28 = vmul.f32 %v915_v24, %v971_v61 }
  0xb4   :  { %v1030_v36 = vadd.f32 %v338_v31, %v257_v33 }
  0xb5   :  { %484 = vperm.xlu0 %715, %v59_v34   ;;  %v64_v34 = vld [vmem:[%s1241_s4 + $0x30] sm:$0xff] }
  0xb6   :  { %382 = vperm.xlu2 %716, %v45_v22   ;;  %v1032_v20 = vpop.permute.xlu0 %325  ;;  %534 = vperm.xlu1 %717, %v69_v35   ;;  %v278_v37 = vpop.permute.xlu2 %277  ;;  %v61_v22 = vld [vmem:[%s1241_s4 + $0x18] sm:$0xff] }
  0xb7   :  { %v205_v38 = vpop.permute.xlu1 %204  ;;  %v335_v39 = vmul.f32 %v1013_v18, %v278_v37 }
  0xb8   :  { %v244_v43 = vmul.f32 %v915_v24, %v205_v38  ;;  %v245_v38 = vmul.f32 %v915_v24, %v986_v3 }
  0xb9   :  { %v1039_v44 = vadd.f32 %v335_v39, %v921_v30 }
  0xba   :  { %v260_v46 = vadd.f32 %v244_v43, %v163_v40 }
  0xbc   :  { %v1051_v49 = vadd.f32 %v341_v45, %v260_v46  ;;  %v63_v46 = vld [vmem:[%s1241_s4 + $0x28] sm:$0xff] }
  0xbd   :  { %514 = vperm.xlu0 %715, %v65_v47  }
  0xbe   :  { %387 = vperm.xlu2 %716, %v46_v48   ;;  %529 = vperm.xlu1 %717, %v68_v21   ;;  %v286_v30 = vpop.permute.xlu2 %285 }
  0xbf   :  { %v217_v50 = vpop.permute.xlu1 %216  ;;  %v337_v51 = vmul.f32 %v1013_v18, %v286_v30  ;;  %v77_v52 = vpop.permute.xlu0 %76 }
  0xc0   :  { %v247_v57 = vmul.f32 %v915_v24, %v217_v50  ;;  %v155_v58 = vmul.f32 %v912_v23, %v77_v52 }
  0xc1   :  { %v1060_v59 = vadd.f32 %v337_v51, %v958_v54  ;;  %v67_v54 = vld [vmem:[%s1241_s4 + $0x48] sm:$0xff] }
  0xc2   :  { %v263_v1 = vadd.f32 %v247_v57, %v166_v55  ;;  %v252_v2 = vadd.f32 %v236_v56, %v155_v58 }
  0xc4   :  { %v1074_v5 = vadd.f32 %v344_v0, %v263_v1  ;;  %v1076_v6 = vadd.f32 %v333_v60, %v252_v2  ;;  %v251_v0 = vmul.f32 %v915_v24, %v1015_v19 }
  0xc5   :  { %499 = vperm.xlu0 %715, %v62_v25  }
  0xc6   :  { %479 = vperm.xlu2 %716, %v58_v4   ;;  %524 = vperm.xlu1 %717, %v67_v54   ;;  %v298_v62 = vpop.permute.xlu2 %297 }
  0xc7   :  { %v229_v7 = vpop.permute.xlu1 %228  ;;  %v340_v8 = vmul.f32 %v1013_v18, %v298_v62  ;;  %v82_v10 = vpop.permute.xlu0 %81 }
  0xc8   :  { %v156_v12 = vmul.f32 %v912_v23, %v82_v10 }
  0xc9   :  { %v1083_v13 = vadd.f32 %v340_v8, %v940_v42  ;;  %v250_v8 = vmul.f32 %v915_v24, %v229_v7 }
  0xca   :  { %v253_v15 = vadd.f32 %v237_v11, %v156_v12  ;;  %v169_v12 = vmul.f32 %v912_v23, %v927_v32 }
  0xcc   :  { %v266_v19 = vadd.f32 %v250_v8, %v169_v12 }
  0xce   :  { %489 = vperm.xlu2 %716, %v60_v16   ;;  %519 = vperm.xlu1 %717, %v66_v17   ;;  %v1091_v26 = vpop.permute.xlu2 %309 }
  0xcf   :  { %v107_v27 = vpop.permute.xlu0 %106  ;;  %v274_v41 = vpop.permute.xlu1 %273 }
  0xd0   :  { %v161_v42 = vmul.f32 %v912_v23, %v107_v27  ;;  %v334_v29 = vmul.f32 %v1013_v18, %v274_v41  ;;  %v347_v41 = vmul.f32 %v1013_v18, %v1032_v20  ;;  %v248_v20 = vmul.f32 %v915_v24, %v997_v9 }
  0xd2   :  { %v258_v31 = vadd.f32 %v242_v28, %v161_v42  ;;  %v1097_v33 = vadd.f32 %v334_v29, %v253_v15  ;;  %v363_v29 = vadd.f32 %v347_v41, %v266_v19 }
  0xd6   :  { %509 = vperm.xlu2 %716, %v64_v34   ;;  %494 = vperm.xlu1 %717, %v61_v22   ;;  %v322_v35 = vpop.permute.xlu2 %321 }
  0xd7   :  { %v122_v37 = vpop.permute.xlu0 %121  ;;  %v282_v61 = vpop.permute.xlu1 %281  ;;  %v346_v10 = vmul.f32 %v1013_v18, %v322_v35 }
  0xd8   :  { %v164_v39 = vmul.f32 %v912_v23, %v122_v37  ;;  %v336_v40 = vmul.f32 %v1013_v18, %v282_v61 }
  0xd9   :  { %v362_v27 = vadd.f32 %v346_v10, %v975_v63 }
  0xda   :  { %v261_v43 = vadd.f32 %v245_v38, %v164_v39  ;;  %v1110_v45 = vadd.f32 %v336_v40, %v1001_v14 }
  0xde   :  { %504 = vperm.xlu1 %717, %v63_v46  }
  0xdf   :  { %v137_v47 = vpop.permute.xlu0 %136  ;;  %v294_v48 = vpop.permute.xlu1 %293 }
  0xe0   :  { %v339_v21 = vmul.f32 %v1013_v18, %v294_v48  ;;  %v443_v30 = vpop.permute.xlu2 %442  ;;  %v167_v61 = vmul.f32 %v912_v23, %v137_v47 }
  0xe2   :  { %v1116_v50 = vadd.f32 %v339_v21, %v258_v31  ;;  %v264_v46 = vadd.f32 %v248_v20, %v167_v61 }
  0xe7   :  { %v152_v3 = vpop.permute.xlu0 %151  ;;  %v306_v51 = vpop.permute.xlu1 %305 }
  0xe8   :  { %v342_v52 = vmul.f32 %v1013_v18, %v306_v51  ;;  %v428_v55 = vpop.permute.xlu2 %427  ;;  %v170_v60 = vmul.f32 %v912_v23, %v152_v3 }
  0xea   :  { %v1119_v56 = vadd.f32 %v342_v52, %v261_v43  ;;  %v267_v25 = vadd.f32 %v251_v0, %v170_v60 }
  0xef   :  { %v438_v14 = vpop.permute.xlu0 %437  ;;  %v318_v57 = vpop.permute.xlu1 %317 }
  0xf0   :  { %v555_v58 = vpop.permute.xlu2 %554  ;;  %v459_v31 = vadd.f32 %v438_v14, %v363_v29  ;;  %v345_v38 = vmul.f32 %v1013_v18, %v318_v57 }
  0xf2   :  { %v361_v3 = vadd.f32 %v345_v38, %v264_v46 }
  0xf4   :  { %v457_v52 = vadd.f32 %v428_v55, %v361_v3 }
  0xf7   :  { %v1124_v1 = vpop.permute.xlu0 %417  ;;  %v330_v2 = vpop.permute.xlu1 %329 }
  0xf8   :  { %v348_v4 = vmul.f32 %v1013_v18, %v330_v2  ;;  %v1127_v54 = vpop.permute.xlu2 %412 }
  0xfa   :  { %v364_v62 = vadd.f32 %v348_v4, %v267_v25  ;;  %v343_v4 = vmul.f32 %v1013_v18, %v1091_v26 }
  0xfc   :  { %v460_v11 = vadd.f32 %v443_v30, %v364_v62 }
  0xfe   :  { %718 = vtanh.f32 %v460_v11 }
  0xff   :  { %v545_v15 = vpop.permute.xlu0 %544 }
 0x100   :  { %v373_v16 = vpop.permute.xlu2 %372  ;;  %v433_v17 = vpop.permute.xlu1 %432 }
 0x101   :  { %v458_v28 = vadd.f32 %v433_v17, %v362_v27  ;;  %v446_v60 = vadd.f32 %v373_v16, %v1097_v33 }
 0x103   :  { %720 = vtanh.f32 %v458_v28 }
 0x104   :  { %v719_v42 = vpop.eup %718  ;;  %722 = vtanh.f32 %v459_v31  ;;  %v454_v31 = vadd.f32 %v1127_v54, %v1119_v56 }
 0x105   :  { %v1136_v7 = vmul.f32 %v719_v42, %v555_v58  ;;  %724 = vtanh.f32 %v457_v52 }
 0x107   :  { %v1138_v34 = vpop.permute.xlu0 %407  ;;  %v630_v32 = vmul.f32 %v719_v42, %v1136_v7 }
 0x108   :  { %v378_v22 = vpop.permute.xlu2 %377  ;;  %v423_v35 = vpop.permute.xlu1 %422  ;;  %v453_v61 = vadd.f32 %v1138_v34, %v1051_v49 }
 0x109   :  { %v646_v37 = vsub.f32 %v555_v58, %v630_v32  ;;  %v721_v63 = vpop.eup %720  ;;  %v447_v0 = vadd.f32 %v378_v22, %v1039_v44  ;;  %v456_v2 = vadd.f32 %v423_v35, %v1074_v5  ;;  %v359_v44 = vadd.f32 %v343_v4, %v956_v53 }
 0x10a   :  { %v1145_v40 = vmul.f32 %v721_v63, %v545_v15  ;;  %v723_v43 = vpop.eup %722 }
 0x10b   :  { %647 = vmatpush.msra.mxu0 %v646_v37  ;;  %v725_v55 = vpop.eup %724  ;;  %v455_v12 = vadd.f32 %v1124_v1, %v359_v44 }
 0x10c   :  { %v628_v23 = vmul.f32 %v721_v63, %v1145_v40 }
 0x10e   :  { %v644_v9 = vsub.f32 %v545_v15, %v628_v23 }
 0x10f   :  { %v403_v39 = vpop.permute.xlu0 %402 }
 0x110   :  { %v1147_v48 = vpop.permute.xlu2 %382  ;;  %v550_v21 = vpop.permute.xlu1 %549  ;;  %v452_v63 = vadd.f32 %v403_v39, %v1083_v13 }
 0x111   :  { %v1149_v30 = vmul.f32 %v723_v43, %v550_v21  ;;  %v448_v13 = vadd.f32 %v1147_v48, %v1110_v45 }
 0x113   :  { %v629_v51 = vmul.f32 %v723_v43, %v1149_v30 }
 0x115   :  { %v645_v47 = vsub.f32 %v550_v21, %v629_v51 }
 0x117   :  { %v398_v24 = vpop.permute.xlu0 %397  ;;  %648 = vmatpush.msra.mxu0 %v645_v47 }
 0x118   :  { %v1153_v14 = vpop.permute.xlu2 %387  ;;  %v368_v57 = vpop.permute.xlu1 %367  ;;  %v451_v38 = vadd.f32 %v398_v24, %v1116_v50 }
 0x119   :  { %649 = vmatpush.msra.mxu0 %v644_v9  ;;  %v445_v58 = vadd.f32 %v368_v57, %v1076_v6  ;;  %v449_v50 = vadd.f32 %v1153_v14, %v1060_v59 }
 0x11b   :  { %726 = vtanh.f32 %v445_v58 }
 0x11c   :  { %728 = vtanh.f32 %v446_v60 }
 0x11d   :  { %730 = vtanh.f32 %v447_v0 }
 0x11e   :  { %732 = vtanh.f32 %v456_v2 }
 0x11f   :  { %v1159_v25 = vpop.permute.xlu0 %392  ;;  %734 = vtanh.f32 %v455_v12 }
 0x120   :  { %v1163_v62 = vpop.permute.xlu2 %479  ;;  %v540_v8 = vpop.permute.xlu1 %539  ;;  %736 = vtanh.f32 %v454_v31  ;;  %v450_v45 = vadd.f32 %v1159_v25, %v1030_v36 }
 0x121   :  { %v1165_v10 = vmul.f32 %v725_v55, %v540_v8  ;;  %v1169_v5 = vpop.eup %726  ;;  %738 = vtanh.f32 %v452_v63 }
 0x122   :  { %v1171_v11 = vpop.eup %728  ;;  %v1180_v19 = vmul.f32 %v1169_v5, %v1163_v62  ;;  %740 = vtanh.f32 %v453_v61 }
 0x123   :  { %v627_v6 = vmul.f32 %v725_v55, %v1165_v10  ;;  %v1174_v18 = vpop.eup %730  ;;  %742 = vtanh.f32 %v451_v38 }
 0x124   :  { %v733_v15 = vpop.eup %732  ;;  %744 = vtanh.f32 %v448_v13  ;;  %v615_v38 = vmul.f32 %v1169_v5, %v1180_v19 }
 0x125   :  { %v643_v33 = vsub.f32 %v540_v8, %v627_v6  ;;  %v735_v32 = vpop.eup %734  ;;  %746 = vtanh.f32 %v449_v50 }
 0x126   :  { %v737_v43 = vpop.eup %736  ;;  %748 = vtanh.f32 %v450_v45 }
 0x127   :  { %v1176_v26 = vpop.permute.xlu0 %484  ;;  %650 = vmatpush.msra.mxu0 %v643_v33  ;;  %v739_v51 = vpop.eup %738 }
 0x128   :  { %v1184_v53 = vmul.f32 %v1171_v11, %v1176_v26  ;;  %v1186_v16 = vpop.permute.xlu2 %489  ;;  %v535_v17 = vpop.permute.xlu1 %534 }
 0x129   :  { %v1190_v1 = vmul.f32 %v1174_v18, %v1186_v16  ;;  %v1192_v27 = vmul.f32 %v733_v15, %v535_v17  ;;  %v741_v23 = vpop.eup %740 }
 0x12a   :  { %v573_v41 = vadd.f32 %v1184_v53, %v1180_v19  ;;  %v743_v34 = vpop.eup %742  ;;  %v616_v63 = vmul.f32 %v1171_v11, %v1184_v53  ;;  %v25_v11 = vld [vmem:[%s1238_s1] sm:$0x7]  ;;  %s805_s1 = smov [#allocation4]  }
 0x12b   :  { %v626_v28 = vmul.f32 %v733_v15, %v1192_v27  ;;  %v745_v0 = vpop.eup %744  ;;  %s684_s17 = sshll.u32 %s805_s1, 4  ;;  %s685_s17 = int_to_ptr.vmem [resolvable:$true] %s684_s17 }
 0x12c   :  { %v574_v42 = vadd.f32 %v573_v41, %v1190_v1  ;;  %v747_v14 = vpop.eup %746 }
 0x12d   :  { %v642_v29 = vsub.f32 %v535_v17, %v626_v28  ;;  %v749_v33 = vpop.eup %748 }
 0x12f   :  { %651 = vmatpush.msra.mxu0 %v642_v29  ;;  %v515_v21 = vpop.permute.xlu0 %514 }
 0x130   :  { %v530_v22 = vpop.permute.xlu1 %529  ;;  %v510_v39 = vpop.permute.xlu2 %509  ;;  %v564_v49 = vmul.f32 %v739_v51, %v515_v21 }
 0x131   :  { %v1200_v35 = vmul.f32 %v735_v32, %v530_v22  ;;  %v563_v52 = vmul.f32 %v743_v34, %v510_v39 }
 0x132   :  { %v622_v57 = vmul.f32 %v739_v51, %v564_v49 }
 0x133   :  { %v625_v37 = vmul.f32 %v735_v32, %v1200_v35  ;;  %v621_v60 = vmul.f32 %v743_v34, %v563_v52 }
 0x134   :  { %v638_v48 = vsub.f32 %v515_v21, %v622_v57 }
 0x135   :  { %v641_v20 = vsub.f32 %v530_v22, %v625_v37  ;;  %v637_v59 = vsub.f32 %v510_v39, %v621_v60  ;;  %v617_v22 = vmul.f32 %v1174_v18, %v1190_v1  ;;  %v631_v1 = vsub.f32 %v1163_v62, %v615_v38 }
 0x137   :  { %652 = vmatpush.msra.mxu0 %v641_v20  ;;  %v500_v2 = vpop.permute.xlu0 %499  ;;  %v633_v20 = vsub.f32 %v1186_v16, %v617_v22 }
 0x138   :  { %v525_v56 = vpop.permute.xlu1 %524  ;;  %v561_v8 = vmul.f32 %v747_v14, %v500_v2 }
 0x139   :  { %v566_v54 = vmul.f32 %v737_v43, %v525_v56 }
 0x13a   :  { %v619_v17 = vmul.f32 %v747_v14, %v561_v8 }
 0x13b   :  { %v624_v46 = vmul.f32 %v737_v43, %v566_v54 }
 0x13c   :  { %v635_v31 = vsub.f32 %v500_v2, %v619_v17 }
 0x13d   :  { %v640_v3 = vsub.f32 %v525_v56, %v624_v46  ;;  %v632_v56 = vsub.f32 %v1176_v26, %v616_v63 }
 0x13f   :  { %653 = vmatpush.msra.mxu0 %v640_v3 }
 0x140   :  { %v520_v47 = vpop.permute.xlu1 %519 }
 0x141   :  { %v565_v24 = vmul.f32 %v741_v23, %v520_v47 }
 0x143   :  { %v623_v9 = vmul.f32 %v741_v23, %v565_v24 }
 0x145   :  { %v639_v58 = vsub.f32 %v520_v47, %v623_v9 }
 0x147   :  { %654 = vmatpush.msra.mxu0 %v639_v58 }
 0x148   :  { %v495_v55 = vpop.permute.xlu1 %494 }
 0x149   :  { %v560_v4 = vmul.f32 %v745_v0, %v495_v55  ;;  %655 = vmatpush.msra.mxu0 %v638_v48 }
 0x14b   :  { %v575_v6 = vadd.f32 %v574_v42, %v560_v4  ;;  %656 = vmatpush.msra.mxu0 %v637_v59  ;;  %v618_v29 = vmul.f32 %v745_v0, %v560_v4 }
 0x14d   :  { %v576_v44 = vadd.f32 %v575_v6, %v561_v8  ;;  %v634_v42 = vsub.f32 %v495_v55, %v618_v29 }
 0x150   :  { %v505_v12 = vpop.permute.xlu1 %504 }
 0x151   :  { %v562_v15 = vmul.f32 %v749_v33, %v505_v12 }
 0x153   :  { %v577_v41 = vadd.f32 %v576_v44, %v562_v15  ;;  %v620_v36 = vmul.f32 %v749_v33, %v562_v15 }
 0x155   :  { %v578_v25 = vadd.f32 %v577_v41, %v563_v52  ;;  %v636_v28 = vsub.f32 %v505_v12, %v620_v36 }
 0x157   :  { %v579_v32 = vadd.f32 %v578_v25, %v564_v49  ;;  %657 = vmatpush.msra.mxu0 %v636_v28 }
 0x159   :  { %v580_v37 = vadd.f32 %v579_v32, %v565_v24  ;;  %658 = vmatpush.msra.mxu0 %v635_v31 }
 0x15b   :  { %v581_v61 = vadd.f32 %v580_v37, %v566_v54  ;;  %659 = vmatpush.msra.mxu0 %v634_v42 }
 0x15d   :  { %v582_v43 = vadd.f32 %v581_v61, %v1200_v35  ;;  %660 = vmatpush.msra.mxu0 %v633_v20  ;;  %v594_v35 = vlaneseq }
 0x15f   :  { %v583_v18 = vadd.f32 %v582_v43, %v1192_v27  ;;  %661 = vmatpush.msra.mxu0 %v632_v56  ;;  %v595_v46 = vand.u32 127, %v594_v35 }
 0x161   :  { %662 = vmatpush.msra.mxu0 %v631_v1  ;;  %v584_v53 = vadd.f32 %v583_v18, %v1165_v10  ;;  %vm599_vm0 = vcmp.lt.s32.totalorder %v595_v46, 32 }
 0x162   :  { %663 = vmatmul.f32.vlgmr.msra.gmra.mxu0 %v25_v11 }
 0x163   :  { %v585_v5 = vadd.f32 %v584_v53, %v1145_v40 }
 0x165   :  { %v586_v19 = vadd.f32 %v585_v5, %v1149_v30 }
 0x167   :  { %v587_v16 = vadd.f32 %v586_v19, %v1136_v7 }
 0x169   :  { %v588_v26 = vrot.slane %v587_v16, 4 }
 0x16b   :  { %v589_v27 = vadd.f32 %v588_v26, %v587_v16 }
 0x16d   :  { %v590_v54 = vrot.slane %v589_v27, 2 }
 0x16f   :  { %v591_v62 = vadd.f32 %v590_v54, %v589_v27 }
 0x171   :  { %v592_v21 = vrot.slane %v591_v62, 1 }
 0x173   :  { %v593_v3 = vadd.f32 %v592_v21, %v591_v62 }
 0x175   :  { %v600_v51 = vsel %vm599_vm0, %v593_v3, 0.0 }
 0x176   :  { %v602_v13 = vsel %vm601_vm1, %v600_v51, 0.0 }
 0x177   :  { %603 = vadd.xlane.f32.xlu2 %v602_v13 }
 0x1df   :  { %v664_v34 = vpop.f32.mrf.mxu0 }
 0x1e0   :  { %667 = vst [vmem:[#allocation4] sm:$0x7] %v664_v34 }
 0x1e1   :  { %689 = dma.vmem_to_hbm [thread:$0]  %s685_s17, 64, %s687_s20, [#allocation5]  }
 0x1ea   :  { %v604_v10 = vpop.xlane.xlu2 %603 }
 0x1eb   :  { %v605_v39 = vrot.slane %v604_v10, 4 }
 0x1ed   :  { %v606_v40 = vadd.f32 %v605_v39, %v604_v10 }
 0x1ef   :  { %v607_v23 = vrot.slane %v606_v40, 2 }
 0x1f1   :  { %v608_v30 = vadd.f32 %v607_v23, %v606_v40 }
 0x1f3   :  { %v609_v49 = vrot.slane %v608_v30, 1 }
 0x1f5   :  { %v610_v7 = vadd.f32 %v609_v49, %v608_v30 }
 0x1f7   :  { %700 = vpush %v610_v7 }
 0x228   :  { %s701_s26 = spop %700 }
 0x229   :  { %v612_v50 = vstv %s701_s26 }
 0x22a   :  { %614 = vst [vmem:[#allocation2] sm:$0xff] %v612_v50 }
 0x22b   :  { %678 = dma.vmem_to_hbm [thread:$0]  %s674_s22, 128, %s676_s25, [#allocation3]  }
 0x22c   :  { %798 = dma.done.wait [#allocation3], 128  }
 0x22d   :  { %799 = vsyncadd [#allocation3], 4294967168 }
 0x22e   :  { %800 = dma.done.wait [#allocation5], 64  }
 0x22f   :  { %801 = vsyncadd [#allocation5], 4294967232 }
 0x230   :  { %698 = vsyncpa [#allocation3], 1 }
 0x231   :  { %699 = vsyncpa [#allocation5], 1 }

</bundles_post_ra>
